<compile_context>
chip_gen: v7x
topology: tpu7x:2x2x1
jax: 0.10.0
libtpu: 0.0.40
codegen_flags: <defaults>
</compile_context>

<pallas_src>
import jax
import jax.numpy as jnp
from jax.experimental import pallas as pl
from jax.experimental.pallas import tpu as pltpu


C = 8            # in_channels == out_channels
MAX_TPIX = 8192  # cap on pixels (lanes) per grid step


def asff5_kernel(f1_ref, f2_ref, f3_ref, f4_ref, f5_ref,
                 w1_ref, b1_ref,
                 w2_ref, b2_ref,
                 w3_ref, b3_ref,
                 wa_ref, ba_ref,
                 we_ref, be_ref,
                 out_ref):
    # Feature tiles are (C, TPIX): channels on sublanes, pixels on lanes.
    x1 = f1_ref[...]
    x2 = f2_ref[...]
    x3 = f3_ref[...]
    x4 = f4_ref[...]
    x5 = f5_ref[...]

    def conv_bn_relu(w_ref, b_ref, x):
        # BN scale already folded into w; b is (C, 1) -> lane broadcast.
        y = jnp.dot(w_ref[...], x, preferred_element_type=jnp.float32)
        return jnp.maximum(y + b_ref[...], 0.0)

    w1 = conv_bn_relu(w1_ref, b1_ref, x1)
    w2 = conv_bn_relu(w2_ref, b2_ref, x2)
    w3 = conv_bn_relu(w3_ref, b3_ref, x3)
    # forward() reuses weight3 for f4 and f5 (reproduced on purpose)
    w4 = conv_bn_relu(w3_ref, b3_ref, x4)
    w5 = conv_bn_relu(w3_ref, b3_ref, x5)

    # weight_All: conv1x1 over cat(w1..w5) == one lane-dense matmul.
    cat = jnp.concatenate([w1, w2, w3, w4, w5], axis=0)        # (5C, TPIX)
    logits = jnp.dot(wa_ref[...], cat,
                     preferred_element_type=jnp.float32) + ba_ref[...]  # (5, TPIX)

    # Softmax over the 5 levels, unrolled into full-width VPU ops.
    l0 = logits[0:1, :]
    l1 = logits[1:2, :]
    l2 = logits[2:3, :]
    l3 = logits[3:4, :]
    l4 = logits[4:5, :]
    m = jnp.maximum(jnp.maximum(jnp.maximum(l0, l1), jnp.maximum(l2, l3)), l4)
    e0 = jnp.exp(l0 - m)
    e1 = jnp.exp(l1 - m)
    e2 = jnp.exp(l2 - m)
    e3 = jnp.exp(l3 - m)
    e4 = jnp.exp(l4 - m)
    inv = 1.0 / (e0 + e1 + e2 + e3 + e4)                        # (1, TPIX)

    fused = (x1 * (e0 * inv) + x2 * (e1 * inv) + x3 * (e2 * inv)
             + x4 * (e3 * inv) + x5 * (e4 * inv))               # (C, TPIX)

    # expand_conv (BN scale folded into weights).
    y = jnp.dot(we_ref[...], fused, preferred_element_type=jnp.float32)
    out_ref[...] = jnp.maximum(y + be_ref[...], 0.0)


def fold_bn(gamma, beta, mean, var, eps=1e-5):
    scale = gamma / jnp.sqrt(var + eps)
    bias = beta - mean * scale
    return scale, bias


def _pick_tile(hw, cap=MAX_TPIX):
    """Largest legal lane tile: full extent if small, else a 128-multiple divisor."""
    if hw <= cap:
        return hw                      # full-extent block is always legal
    t = (cap // 128) * 128
    while t >= 128:
        if hw % t == 0:
            return t
        t -= 128
    return hw                          # fallback: one tile per row (still legal)


def asff5_forward(fs, params):
    """fs: list of 5 arrays of shape (N, C, H, W). Returns (N, C, H, W)."""
    N, Cc, H, W = fs[0].shape
    assert Cc == C
    HW = H * W
    TPIX = _pick_tile(HW)
    assert HW % TPIX == 0
    n_tiles = HW // TPIX

    # Free reshape: NCHW -> (N, C, H*W).  No transposes anywhere.
    xs = [x.reshape(N, Cc, HW) for x in fs]

    feat_spec = pl.BlockSpec((None, Cc, TPIX), lambda n, t: (n, 0, t))

    def full_spec(shape):
        return pl.BlockSpec(shape, lambda n, t: (0, 0))

    in_specs = [feat_spec] * 5 + [full_spec(p.shape) for p in params]

    P = N * HW
    cost = pl.CostEstimate(
        flops=int(P * (5 * 2 * Cc * Cc        # 5 conv1x1+bn
                       + 2 * (5 * Cc) * 5     # weight_All
                       + 2 * 5 * Cc           # fusion
                       + 2 * Cc * Cc)),       # expand conv
        transcendentals=int(5 * P),
        bytes_accessed=int(6 * P * Cc * 4 + sum(int(p.size) for p in params) * 4),
    )

    out3d = pl.pallas_call(
        asff5_kernel,
        out_shape=jax.ShapeDtypeStruct((N, Cc, HW), jnp.float32),
        grid_spec=pltpu.PrefetchScalarGridSpec(
            num_scalar_prefetch=0,
            grid=(N, n_tiles),
            in_specs=in_specs,
            out_specs=feat_spec,
        ),
        compiler_params=pltpu.CompilerParams(
            dimension_semantics=("parallel", "parallel")),
        cost_estimate=cost,
    )(*xs, *params)

    return out3d.reshape(N, Cc, H, W)


# ----------------------- pure-JAX reference (NCHW, matches PyTorch) -------------

def ref_forward(fs, raw):
    def conv1x1(x, w, b=None):
        y = jnp.einsum('nchw,oc->nohw', x, w)
        if b is not None:
            y = y + b[None, :, None, None]
        return y

    def bn_relu(x, gamma, beta, mean, var, eps=1e-5):
        s = gamma / jnp.sqrt(var + eps)
        y = (x - mean[None, :, None, None]) * s[None, :, None, None] \
            + beta[None, :, None, None]
        return jnp.maximum(y, 0.0)

    f1, f2, f3, f4, f5 = fs
    W1, bn1, W2, bn2, W3, bn3, Wa, ba, We, bne = raw
    w1 = bn_relu(conv1x1(f1, W1), *bn1)
    w2 = bn_relu(conv1x1(f2, W2), *bn2)
    w3 = bn_relu(conv1x1(f3, W3), *bn3)
    w4 = bn_relu(conv1x1(f4, W3), *bn3)   # same weight3 reuse as the module
    w5 = bn_relu(conv1x1(f5, W3), *bn3)
    cat = jnp.concatenate([w1, w2, w3, w4, w5], axis=1)
    logits = conv1x1(cat, Wa, ba)
    sm = jax.nn.softmax(logits, axis=1)
    fused = (f1 * sm[:, 0:1] + f2 * sm[:, 1:2] + f3 * sm[:, 2:3]
             + f4 * sm[:, 3:4] + f5 * sm[:, 4:5])
    return bn_relu(conv1x1(fused, We), *bne)


if __name__ == "__main__":
    key = jax.random.PRNGKey(0)
    N, H, W = 2, 16, 16
    keys = jax.random.split(key, 32)
    ki = iter(keys)

    # inputs
    fs = [jax.random.normal(next(ki), (N, C, H, W), jnp.float32) for _ in range(5)]

    def make_conv(k):
        return jax.random.normal(k, (C, C), jnp.float32) * 0.3   # (out, in)

    def make_bn(k):
        ka, kb, kc, kd = jax.random.split(k, 4)
        gamma = 1.0 + 0.1 * jax.random.normal(ka, (C,), jnp.float32)
        beta = 0.1 * jax.random.normal(kb, (C,), jnp.float32)
        mean = 0.1 * jax.random.normal(kc, (C,), jnp.float32)
        var = 1.0 + 0.1 * jnp.abs(jax.random.normal(kd, (C,), jnp.float32))
        return gamma, beta, mean, var

    W1, bn1 = make_conv(next(ki)), make_bn(next(ki))
    W2, bn2 = make_conv(next(ki)), make_bn(next(ki))
    W3, bn3 = make_conv(next(ki)), make_bn(next(ki))
    Wa = jax.random.normal(next(ki), (5, 5 * C), jnp.float32) * 0.2   # weight_All weight
    ba = 0.1 * jax.random.normal(next(ki), (5,), jnp.float32)         # weight_All bias
    We, bne = make_conv(next(ki)), make_bn(next(ki))

    raw = (W1, bn1, W2, bn2, W3, bn3, Wa, ba, We, bne)

    # Fold BN (eval mode) into per-channel scale/bias, then fold the scale into
    # the conv weights so the kernel only needs W and a bias per conv.
    s1, b1 = fold_bn(*bn1)
    s2, b2 = fold_bn(*bn2)
    s3, b3 = fold_bn(*bn3)
    se, be = fold_bn(*bne)
    params = (
        W1 * s1[:, None], b1.reshape(C, 1),
        W2 * s2[:, None], b2.reshape(C, 1),
        W3 * s3[:, None], b3.reshape(C, 1),
        Wa, ba.reshape(5, 1),
        We * se[:, None], be.reshape(C, 1),
    )

    out = asff5_forward(fs, params)
    out = jax.block_until_ready(out)

    ref = ref_forward(fs, raw)
    assert out.shape == (N, C, H, W)
    assert jnp.allclose(out, ref, atol=1e-4, rtol=1e-4), \
        f"max abs err {jnp.max(jnp.abs(out - ref))}"

    print("KERNEL_OK")
</pallas_src>

<mosaic_0001>
module attributes {stable_mosaic.version = 11 : i64} {
  func.func @asff5_kernel(%arg0: i32, %arg1: i32, %arg2: memref<1x8x256xf32, #tpu.memory_space<vmem>>, %arg3: memref<1x8x256xf32, #tpu.memory_space<vmem>>, %arg4: memref<1x8x256xf32, #tpu.memory_space<vmem>>, %arg5: memref<1x8x256xf32, #tpu.memory_space<vmem>>, %arg6: memref<1x8x256xf32, #tpu.memory_space<vmem>>, %arg7: memref<8x8xf32, #tpu.memory_space<vmem>>, %arg8: memref<8x1xf32, #tpu.memory_space<vmem>>, %arg9: memref<8x8xf32, #tpu.memory_space<vmem>>, %arg10: memref<8x1xf32, #tpu.memory_space<vmem>>, %arg11: memref<8x8xf32, #tpu.memory_space<vmem>>, %arg12: memref<8x1xf32, #tpu.memory_space<vmem>>, %arg13: memref<5x40xf32, #tpu.memory_space<vmem>>, %arg14: memref<5x1xf32, #tpu.memory_space<vmem>>, %arg15: memref<8x8xf32, #tpu.memory_space<vmem>>, %arg16: memref<8x1xf32, #tpu.memory_space<vmem>>, %arg17: memref<1x8x256xf32, #tpu.memory_space<vmem>>) attributes {dimension_semantics = [#tpu.dimension_semantics<parallel>, #tpu.dimension_semantics<parallel>], iteration_bounds = array<i64: 2, 1>, scalar_prefetch = 0 : i64, scratch_operands = 0 : i64, tpu.core_type = #tpu.core_type<tc>, window_params = [{transform_indices = @transform_0, window_bounds = array<i64: 1, 8, 256>}, {transform_indices = @transform_1, window_bounds = array<i64: 1, 8, 256>}, {transform_indices = @transform_2, window_bounds = array<i64: 1, 8, 256>}, {transform_indices = @transform_3, window_bounds = array<i64: 1, 8, 256>}, {transform_indices = @transform_4, window_bounds = array<i64: 1, 8, 256>}, {pipeline_mode = #tpu.pipeline_mode<synchronous>, transform_indices = @transform_5, window_bounds = array<i64: 8, 8>}, {pipeline_mode = #tpu.pipeline_mode<synchronous>, transform_indices = @transform_6, window_bounds = array<i64: 8, 1>}, {pipeline_mode = #tpu.pipeline_mode<synchronous>, transform_indices = @transform_7, window_bounds = array<i64: 8, 8>}, {pipeline_mode = #tpu.pipeline_mode<synchronous>, transform_indices = @transform_8, window_bounds = array<i64: 8, 1>}, {pipeline_mode = #tpu.pipeline_mode<synchronous>, transform_indices = @transform_9, window_bounds = array<i64: 8, 8>}, {pipeline_mode = #tpu.pipeline_mode<synchronous>, transform_indices = @transform_10, window_bounds = array<i64: 8, 1>}, {pipeline_mode = #tpu.pipeline_mode<synchronous>, transform_indices = @transform_11, window_bounds = array<i64: 5, 40>}, {pipeline_mode = #tpu.pipeline_mode<synchronous>, transform_indices = @transform_12, window_bounds = array<i64: 5, 1>}, {pipeline_mode = #tpu.pipeline_mode<synchronous>, transform_indices = @transform_13, window_bounds = array<i64: 8, 8>}, {pipeline_mode = #tpu.pipeline_mode<synchronous>, transform_indices = @transform_14, window_bounds = array<i64: 8, 1>}, {transform_indices = @transform_15, window_bounds = array<i64: 1, 8, 256>}]} {
    %c0 = arith.constant 0 : index
    %c0_0 = arith.constant 0 : index
    %c0_1 = arith.constant 0 : index
    %0 = vector.load %arg2[%c0, %c0_0, %c0_1] : memref<1x8x256xf32, #tpu.memory_space<vmem>>, vector<1x8x256xf32>
    %1 = vector.shape_cast %0 : vector<1x8x256xf32> to vector<8x256xf32>
    %c0_2 = arith.constant 0 : index
    %c0_3 = arith.constant 0 : index
    %c0_4 = arith.constant 0 : index
    %2 = vector.load %arg3[%c0_2, %c0_3, %c0_4] : memref<1x8x256xf32, #tpu.memory_space<vmem>>, vector<1x8x256xf32>
    %3 = vector.shape_cast %2 : vector<1x8x256xf32> to vector<8x256xf32>
    %c0_5 = arith.constant 0 : index
    %c0_6 = arith.constant 0 : index
    %c0_7 = arith.constant 0 : index
    %4 = vector.load %arg4[%c0_5, %c0_6, %c0_7] : memref<1x8x256xf32, #tpu.memory_space<vmem>>, vector<1x8x256xf32>
    %5 = vector.shape_cast %4 : vector<1x8x256xf32> to vector<8x256xf32>
    %c0_8 = arith.constant 0 : index
    %c0_9 = arith.constant 0 : index
    %c0_10 = arith.constant 0 : index
    %6 = vector.load %arg5[%c0_8, %c0_9, %c0_10] : memref<1x8x256xf32, #tpu.memory_space<vmem>>, vector<1x8x256xf32>
    %7 = vector.shape_cast %6 : vector<1x8x256xf32> to vector<8x256xf32>
    %c0_11 = arith.constant 0 : index
    %c0_12 = arith.constant 0 : index
    %c0_13 = arith.constant 0 : index
    %8 = vector.load %arg6[%c0_11, %c0_12, %c0_13] : memref<1x8x256xf32, #tpu.memory_space<vmem>>, vector<1x8x256xf32>
    %9 = vector.shape_cast %8 : vector<1x8x256xf32> to vector<8x256xf32>
    %c0_14 = arith.constant 0 : index
    %c0_15 = arith.constant 0 : index
    %10 = vector.load %arg7[%c0_14, %c0_15] : memref<8x8xf32, #tpu.memory_space<vmem>>, vector<8x8xf32>
    %cst = arith.constant dense<0.000000e+00> : vector<8x256xf32>
    %11 = tpu.matmul %10, %1, %cst {dimension_numbers = #tpu.dot_dimension_numbers<[1], [0], [0], [1], [0, 0, 1, 1], [], []>} : vector<8x8xf32>, vector<8x256xf32>, vector<8x256xf32> -> vector<8x256xf32>
    %c0_16 = arith.constant 0 : index
    %c0_17 = arith.constant 0 : index
    %12 = vector.load %arg8[%c0_16, %c0_17] : memref<8x1xf32, #tpu.memory_space<vmem>>, vector<8x1xf32>
    %13 = vector.broadcast %12 : vector<8x1xf32> to vector<8x256xf32>
    %14 = arith.addf %11, %13 : vector<8x256xf32>
    %cst_18 = arith.constant 0.000000e+00 : f32
    %15 = vector.broadcast %cst_18 : f32 to vector<8x256xf32>
    %16 = arith.maximumf %14, %15 : vector<8x256xf32>
    %c0_19 = arith.constant 0 : index
    %c0_20 = arith.constant 0 : index
    %17 = vector.load %arg9[%c0_19, %c0_20] : memref<8x8xf32, #tpu.memory_space<vmem>>, vector<8x8xf32>
    %cst_21 = arith.constant dense<0.000000e+00> : vector<8x256xf32>
    %18 = tpu.matmul %17, %3, %cst_21 {dimension_numbers = #tpu.dot_dimension_numbers<[1], [0], [0], [1], [0, 0, 1, 1], [], []>} : vector<8x8xf32>, vector<8x256xf32>, vector<8x256xf32> -> vector<8x256xf32>
    %c0_22 = arith.constant 0 : index
    %c0_23 = arith.constant 0 : index
    %19 = vector.load %arg10[%c0_22, %c0_23] : memref<8x1xf32, #tpu.memory_space<vmem>>, vector<8x1xf32>
    %20 = vector.broadcast %19 : vector<8x1xf32> to vector<8x256xf32>
    %21 = arith.addf %18, %20 : vector<8x256xf32>
    %cst_24 = arith.constant 0.000000e+00 : f32
    %22 = vector.broadcast %cst_24 : f32 to vector<8x256xf32>
    %23 = arith.maximumf %21, %22 : vector<8x256xf32>
    %c0_25 = arith.constant 0 : index
    %c0_26 = arith.constant 0 : index
    %24 = vector.load %arg11[%c0_25, %c0_26] : memref<8x8xf32, #tpu.memory_space<vmem>>, vector<8x8xf32>
    %cst_27 = arith.constant dense<0.000000e+00> : vector<8x256xf32>
    %25 = tpu.matmul %24, %5, %cst_27 {dimension_numbers = #tpu.dot_dimension_numbers<[1], [0], [0], [1], [0, 0, 1, 1], [], []>} : vector<8x8xf32>, vector<8x256xf32>, vector<8x256xf32> -> vector<8x256xf32>
    %c0_28 = arith.constant 0 : index
    %c0_29 = arith.constant 0 : index
    %26 = vector.load %arg12[%c0_28, %c0_29] : memref<8x1xf32, #tpu.memory_space<vmem>>, vector<8x1xf32>
    %27 = vector.broadcast %26 : vector<8x1xf32> to vector<8x256xf32>
    %28 = arith.addf %25, %27 : vector<8x256xf32>
    %cst_30 = arith.constant 0.000000e+00 : f32
    %29 = vector.broadcast %cst_30 : f32 to vector<8x256xf32>
    %30 = arith.maximumf %28, %29 : vector<8x256xf32>
    %c0_31 = arith.constant 0 : index
    %c0_32 = arith.constant 0 : index
    %31 = vector.load %arg11[%c0_31, %c0_32] : memref<8x8xf32, #tpu.memory_space<vmem>>, vector<8x8xf32>
    %cst_33 = arith.constant dense<0.000000e+00> : vector<8x256xf32>
    %32 = tpu.matmul %31, %7, %cst_33 {dimension_numbers = #tpu.dot_dimension_numbers<[1], [0], [0], [1], [0, 0, 1, 1], [], []>} : vector<8x8xf32>, vector<8x256xf32>, vector<8x256xf32> -> vector<8x256xf32>
    %c0_34 = arith.constant 0 : index
    %c0_35 = arith.constant 0 : index
    %33 = vector.load %arg12[%c0_34, %c0_35] : memref<8x1xf32, #tpu.memory_space<vmem>>, vector<8x1xf32>
    %34 = vector.broadcast %33 : vector<8x1xf32> to vector<8x256xf32>
    %35 = arith.addf %32, %34 : vector<8x256xf32>
    %cst_36 = arith.constant 0.000000e+00 : f32
    %36 = vector.broadcast %cst_36 : f32 to vector<8x256xf32>
    %37 = arith.maximumf %35, %36 : vector<8x256xf32>
    %c0_37 = arith.constant 0 : index
    %c0_38 = arith.constant 0 : index
    %38 = vector.load %arg11[%c0_37, %c0_38] : memref<8x8xf32, #tpu.memory_space<vmem>>, vector<8x8xf32>
    %cst_39 = arith.constant dense<0.000000e+00> : vector<8x256xf32>
    %39 = tpu.matmul %38, %9, %cst_39 {dimension_numbers = #tpu.dot_dimension_numbers<[1], [0], [0], [1], [0, 0, 1, 1], [], []>} : vector<8x8xf32>, vector<8x256xf32>, vector<8x256xf32> -> vector<8x256xf32>
    %c0_40 = arith.constant 0 : index
    %c0_41 = arith.constant 0 : index
    %40 = vector.load %arg12[%c0_40, %c0_41] : memref<8x1xf32, #tpu.memory_space<vmem>>, vector<8x1xf32>
    %41 = vector.broadcast %40 : vector<8x1xf32> to vector<8x256xf32>
    %42 = arith.addf %39, %41 : vector<8x256xf32>
    %cst_42 = arith.constant 0.000000e+00 : f32
    %43 = vector.broadcast %cst_42 : f32 to vector<8x256xf32>
    %44 = arith.maximumf %42, %43 : vector<8x256xf32>
    %45 = tpu.concatenate %16, %23, %30, %37, %44 in 0 : vector<8x256xf32>, vector<8x256xf32>, vector<8x256xf32>, vector<8x256xf32>, vector<8x256xf32> -> vector<40x256xf32>
    %c0_43 = arith.constant 0 : index
    %c0_44 = arith.constant 0 : index
    %46 = vector.load %arg13[%c0_43, %c0_44] : memref<5x40xf32, #tpu.memory_space<vmem>>, vector<5x40xf32>
    %cst_45 = arith.constant dense<0.000000e+00> : vector<5x256xf32>
    %47 = tpu.matmul %46, %45, %cst_45 {dimension_numbers = #tpu.dot_dimension_numbers<[1], [0], [0], [1], [0, 0, 1, 1], [], []>} : vector<5x40xf32>, vector<40x256xf32>, vector<5x256xf32> -> vector<5x256xf32>
    %c0_46 = arith.constant 0 : index
    %c0_47 = arith.constant 0 : index
    %48 = vector.load %arg14[%c0_46, %c0_47] : memref<5x1xf32, #tpu.memory_space<vmem>>, vector<5x1xf32>
    %49 = vector.broadcast %48 : vector<5x1xf32> to vector<5x256xf32>
    %50 = arith.addf %47, %49 : vector<5x256xf32>
    %51 = vector.extract_strided_slice %50 {offsets = [0, 0], sizes = [1, 256], strides = [1, 1]} : vector<5x256xf32> to vector<1x256xf32>
    %52 = vector.extract_strided_slice %50 {offsets = [1, 0], sizes = [1, 256], strides = [1, 1]} : vector<5x256xf32> to vector<1x256xf32>
    %53 = vector.extract_strided_slice %50 {offsets = [2, 0], sizes = [1, 256], strides = [1, 1]} : vector<5x256xf32> to vector<1x256xf32>
    %54 = vector.extract_strided_slice %50 {offsets = [3, 0], sizes = [1, 256], strides = [1, 1]} : vector<5x256xf32> to vector<1x256xf32>
    %55 = vector.extract_strided_slice %50 {offsets = [4, 0], sizes = [1, 256], strides = [1, 1]} : vector<5x256xf32> to vector<1x256xf32>
    %56 = arith.maximumf %51, %52 : vector<1x256xf32>
    %57 = arith.maximumf %53, %54 : vector<1x256xf32>
    %58 = arith.maximumf %56, %57 : vector<1x256xf32>
    %59 = arith.maximumf %58, %55 : vector<1x256xf32>
    %60 = arith.subf %51, %59 : vector<1x256xf32>
    %61 = math.exp %60 : vector<1x256xf32>
    %62 = arith.subf %52, %59 : vector<1x256xf32>
    %63 = math.exp %62 : vector<1x256xf32>
    %64 = arith.subf %53, %59 : vector<1x256xf32>
    %65 = math.exp %64 : vector<1x256xf32>
    %66 = arith.subf %54, %59 : vector<1x256xf32>
    %67 = math.exp %66 : vector<1x256xf32>
    %68 = arith.subf %55, %59 : vector<1x256xf32>
    %69 = math.exp %68 : vector<1x256xf32>
    %70 = arith.addf %61, %63 : vector<1x256xf32>
    %71 = arith.addf %70, %65 : vector<1x256xf32>
    %72 = arith.addf %71, %67 : vector<1x256xf32>
    %73 = arith.addf %72, %69 : vector<1x256xf32>
    %cst_48 = arith.constant 1.000000e+00 : f32
    %74 = vector.broadcast %cst_48 : f32 to vector<1x256xf32>
    %75 = arith.divf %74, %73 : vector<1x256xf32>
    %76 = arith.mulf %61, %75 : vector<1x256xf32>
    %77 = vector.broadcast %76 : vector<1x256xf32> to vector<8x256xf32>
    %78 = arith.mulf %1, %77 : vector<8x256xf32>
    %79 = arith.mulf %63, %75 : vector<1x256xf32>
    %80 = vector.broadcast %79 : vector<1x256xf32> to vector<8x256xf32>
    %81 = arith.mulf %3, %80 : vector<8x256xf32>
    %82 = arith.addf %78, %81 : vector<8x256xf32>
    %83 = arith.mulf %65, %75 : vector<1x256xf32>
    %84 = vector.broadcast %83 : vector<1x256xf32> to vector<8x256xf32>
    %85 = arith.mulf %5, %84 : vector<8x256xf32>
    %86 = arith.addf %82, %85 : vector<8x256xf32>
    %87 = arith.mulf %67, %75 : vector<1x256xf32>
    %88 = vector.broadcast %87 : vector<1x256xf32> to vector<8x256xf32>
    %89 = arith.mulf %7, %88 : vector<8x256xf32>
    %90 = arith.addf %86, %89 : vector<8x256xf32>
    %91 = arith.mulf %69, %75 : vector<1x256xf32>
    %92 = vector.broadcast %91 : vector<1x256xf32> to vector<8x256xf32>
    %93 = arith.mulf %9, %92 : vector<8x256xf32>
    %94 = arith.addf %90, %93 : vector<8x256xf32>
    %c0_49 = arith.constant 0 : index
    %c0_50 = arith.constant 0 : index
    %95 = vector.load %arg15[%c0_49, %c0_50] : memref<8x8xf32, #tpu.memory_space<vmem>>, vector<8x8xf32>
    %cst_51 = arith.constant dense<0.000000e+00> : vector<8x256xf32>
    %96 = tpu.matmul %95, %94, %cst_51 {dimension_numbers = #tpu.dot_dimension_numbers<[1], [0], [0], [1], [0, 0, 1, 1], [], []>} : vector<8x8xf32>, vector<8x256xf32>, vector<8x256xf32> -> vector<8x256xf32>
    %c0_52 = arith.constant 0 : index
    %c0_53 = arith.constant 0 : index
    %97 = vector.load %arg16[%c0_52, %c0_53] : memref<8x1xf32, #tpu.memory_space<vmem>>, vector<8x1xf32>
    %98 = vector.broadcast %97 : vector<8x1xf32> to vector<8x256xf32>
    %99 = arith.addf %96, %98 : vector<8x256xf32>
    %cst_54 = arith.constant 0.000000e+00 : f32
    %100 = vector.broadcast %cst_54 : f32 to vector<8x256xf32>
    %101 = arith.maximumf %99, %100 : vector<8x256xf32>
    %c0_55 = arith.constant 0 : index
    %c0_56 = arith.constant 0 : index
    %c0_57 = arith.constant 0 : index
    %102 = vector.load %arg17[%c0_55, %c0_56, %c0_57] : memref<1x8x256xf32, #tpu.memory_space<vmem>>, vector<1x8x256xf32>
    %103 = vector.shape_cast %102 : vector<1x8x256xf32> to vector<8x256xf32>
    %104 = vector.shape_cast %101 : vector<8x256xf32> to vector<1x8x256xf32>
    tpu.vector_store %arg17[%c0_55, %c0_56, %c0_57], %104 {strides = array<i32>} : memref<1x8x256xf32, #tpu.memory_space<vmem>>, vector<1x8x256xf32>,
    return
  }
  func.func @transform_0(%arg0: i32, %arg1: i32) -> (i32, i32, i32) {
    %c0_i32 = arith.constant 0 : i32
    %c0_i32_0 = arith.constant 0 : i32
    return %arg0, %c0_i32, %arg1 : i32, i32, i32
  }
  func.func @transform_1(%arg0: i32, %arg1: i32) -> (i32, i32, i32) {
    %c0_i32 = arith.constant 0 : i32
    %c0_i32_0 = arith.constant 0 : i32
    return %arg0, %c0_i32, %arg1 : i32, i32, i32
  }
  func.func @transform_2(%arg0: i32, %arg1: i32) -> (i32, i32, i32) {
    %c0_i32 = arith.constant 0 : i32
    %c0_i32_0 = arith.constant 0 : i32
    return %arg0, %c0_i32, %arg1 : i32, i32, i32
  }
  func.func @transform_3(%arg0: i32, %arg1: i32) -> (i32, i32, i32) {
    %c0_i32 = arith.constant 0 : i32
    %c0_i32_0 = arith.constant 0 : i32
    return %arg0, %c0_i32, %arg1 : i32, i32, i32
  }
  func.func @transform_4(%arg0: i32, %arg1: i32) -> (i32, i32, i32) {
    %c0_i32 = arith.constant 0 : i32
    %c0_i32_0 = arith.constant 0 : i32
    return %arg0, %c0_i32, %arg1 : i32, i32, i32
  }
  func.func @transform_5(%arg0: i32, %arg1: i32) -> (i32, i32) {
    %c0_i32 = arith.constant 0 : i32
    %c0_i32_0 = arith.constant 0 : i32
    %c0_i32_1 = arith.constant 0 : i32
    return %c0_i32, %c0_i32_0 : i32, i32
  }
  func.func @transform_6(%arg0: i32, %arg1: i32) -> (i32, i32) {
    %c0_i32 = arith.constant 0 : i32
    %c0_i32_0 = arith.constant 0 : i32
    %c0_i32_1 = arith.constant 0 : i32
    return %c0_i32, %c0_i32_0 : i32, i32
  }
  func.func @transform_7(%arg0: i32, %arg1: i32) -> (i32, i32) {
    %c0_i32 = arith.constant 0 : i32
    %c0_i32_0 = arith.constant 0 : i32
    %c0_i32_1 = arith.constant 0 : i32
    return %c0_i32, %c0_i32_0 : i32, i32
  }
  func.func @transform_8(%arg0: i32, %arg1: i32) -> (i32, i32) {
    %c0_i32 = arith.constant 0 : i32
    %c0_i32_0 = arith.constant 0 : i32
    %c0_i32_1 = arith.constant 0 : i32
    return %c0_i32, %c0_i32_0 : i32, i32
  }
  func.func @transform_9(%arg0: i32, %arg1: i32) -> (i32, i32) {
    %c0_i32 = arith.constant 0 : i32
    %c0_i32_0 = arith.constant 0 : i32
    %c0_i32_1 = arith.constant 0 : i32
    return %c0_i32, %c0_i32_0 : i32, i32
  }
  func.func @transform_10(%arg0: i32, %arg1: i32) -> (i32, i32) {
    %c0_i32 = arith.constant 0 : i32
    %c0_i32_0 = arith.constant 0 : i32
    %c0_i32_1 = arith.constant 0 : i32
    return %c0_i32, %c0_i32_0 : i32, i32
  }
  func.func @transform_11(%arg0: i32, %arg1: i32) -> (i32, i32) {
    %c0_i32 = arith.constant 0 : i32
    %c0_i32_0 = arith.constant 0 : i32
    %c0_i32_1 = arith.constant 0 : i32
    return %c0_i32, %c0_i32_0 : i32, i32
  }
  func.func @transform_12(%arg0: i32, %arg1: i32) -> (i32, i32) {
    %c0_i32 = arith.constant 0 : i32
    %c0_i32_0 = arith.constant 0 : i32
    %c0_i32_1 = arith.constant 0 : i32
    return %c0_i32, %c0_i32_0 : i32, i32
  }
  func.func @transform_13(%arg0: i32, %arg1: i32) -> (i32, i32) {
    %c0_i32 = arith.constant 0 : i32
    %c0_i32_0 = arith.constant 0 : i32
    %c0_i32_1 = arith.constant 0 : i32
    return %c0_i32, %c0_i32_0 : i32, i32
  }
  func.func @transform_14(%arg0: i32, %arg1: i32) -> (i32, i32) {
    %c0_i32 = arith.constant 0 : i32
    %c0_i32_0 = arith.constant 0 : i32
    %c0_i32_1 = arith.constant 0 : i32
    return %c0_i32, %c0_i32_0 : i32, i32
  }
  func.func @transform_15(%arg0: i32, %arg1: i32) -> (i32, i32, i32) {
    %c0_i32 = arith.constant 0 : i32
    %c0_i32_0 = arith.constant 0 : i32
    return %arg0, %c0_i32, %arg1 : i32, i32, i32
  }
}

</mosaic_0001>

<bundles_post_ra>
// kernel: tpu_custom_call.1
= control target key start
LH: loop header
LB: loop body
LE: loop exit
PB: predicated region body
PF: predicated region fallthrough
CT: control target
= control target key end

     0   :  { %s2494_s0 = inlined_call_operand.vmem [shape: f32[2,8,256], index: 0, kind: input, shape index: {}]   ;;  %s2495_s1 = inlined_call_operand.hbm [shape: f32[2,8,256], index: 1, kind: input, shape index: {}]   ;;  %s2496_s2 = inlined_call_operand.hbm [shape: f32[2,8,256], index: 2, kind: input, shape index: {}]   ;;  %s2497_s3 = inlined_call_operand.hbm [shape: f32[2,8,256], index: 3, kind: input, shape index: {}]   ;;  %s2498_s4 = inlined_call_operand.hbm [shape: f32[2,8,256], index: 4, kind: input, shape index: {}]   ;;  %s2499_s5 = inlined_call_operand.vmem [shape: f32[8,8], index: 5, kind: input, shape index: {}]   ;;  %s2500_s6 = inlined_call_operand.vmem [shape: f32[8,1], index: 6, kind: input, shape index: {}]   ;;  %s2501_s7 = inlined_call_operand.vmem [shape: f32[8,8], index: 7, kind: input, shape index: {}]   ;;  %s2502_s8 = inlined_call_operand.vmem [shape: f32[8,1], index: 8, kind: input, shape index: {}]   ;;  %s2503_s9 = inlined_call_operand.vmem [shape: f32[8,8], index: 9, kind: input, shape index: {}]   ;;  %s2504_s10 = inlined_call_operand.vmem [shape: f32[8,1], index: 10, kind: input, shape index: {}]   ;;  %s2505_s11 = inlined_call_operand.vmem [shape: f32[5,40], index: 11, kind: input, shape index: {}]   ;;  %s2506_s12 = inlined_call_operand.vmem [shape: f32[5,1], index: 12, kind: input, shape index: {}]   ;;  %s2507_s13 = inlined_call_operand.vmem [shape: f32[8,8], index: 13, kind: input, shape index: {}]   ;;  %s2508_s14 = inlined_call_operand.vmem [shape: f32[8,1], index: 14, kind: input, shape index: {}]   ;;  %s2509_s15 = inlined_call_operand.hbm [shape: f32[2,8,256], index: 15, kind: output, shape index: {}]  }
   0x1   :  { %2524 = sst [smem:[#allocation23_spill]] %s2496_s2 }
   0x2   :  { %2525 = sst [smem:[#allocation24_spill]] %s2500_s6 }
   0x3   :  { %2526 = sst [smem:[#allocation25_spill]] %s2502_s8 }
   0x4   :  { %2527 = sst [smem:[#allocation26_spill]] %s2504_s10 }
   0x5   :  { %2528 = sst [smem:[#allocation27_spill]] %s2505_s11 }
   0x6   :  { %2529 = sst [smem:[#allocation28_spill]] %s2506_s12 }
   0x7   :  { %2530 = sst [smem:[#allocation29_spill]] %s2507_s13 }
   0x8   :  { %2531 = sst [smem:[#allocation30_spill]] %s2508_s14 }
   0x9   :  { %2532 = sst [smem:[#allocation31_spill]] %s2509_s15 }
   0xa   :  { %20 = vsyncpa [#allocation3], 0 }
   0xb   :  { %22 = vsyncpa [#allocation3 + $0x1], 0 }
   0xc   :  { %23 = vsyncpa [#allocation6], 0 }
   0xd   :  { %25 = vsyncpa [#allocation6 + $0x1], 0 }
   0xe   :  { %26 = vsyncpa [#allocation9], 0 }
   0xf   :  { %28 = vsyncpa [#allocation9 + $0x1], 0 }
  0x10   :  { %29 = vsyncpa [#allocation4], 0 }
  0x11   :  { %31 = vsyncpa [#allocation4 + $0x1], 0  ;;  %s2106_s18 = smov 0   ;;  %s2108_s19 = smov 0  }
  0x12   :  { %s2110_s20 = smov 0   ;;  %s2112_s21 = smov 0  }
  0x13   :  { %s2114_s22 = smov 0   ;;  %s2116_s23 = smov 0  }
  0x14 LB: > { %2533 = sst [smem:[#allocation15_spill]] %s1997_s18  ;;  %s2137_s24 = sadd.s32 4294967295, %s2017_s23   ;;  %s2017_s23 = sphi %s2116_s23, %s37_s23   ;;  %s2013_s22 = sphi %s2114_s22, %s2574_s22   ;;  %s2009_s21 = sphi %s2112_s21, %s2573_s21   ;;  %s2005_s20 = sphi %s2110_s20, %s2572_s20   ;;  %s2001_s19 = sphi %s2108_s19, %s2576_s19   ;;  %s1997_s18 = sphi %s2106_s18, %s2575_s18  }
  0x15   : > { %2534 = sst [smem:[#allocation16_spill]] %s2005_s20  ;;  %s1653_s25 = sadd.s32 4294967294, %s2017_s23  }
  0x16   : > { %2535 = sst [smem:[#allocation17_spill]] %s2013_s22  ;;  %s49_s26 = sadd.s32 1, %s2013_s22 }
  0x17   : > { %2536 = sst [smem:[#allocation18_spill]] %s2017_s23  ;;  %s86_s27 = sadd.s32 1, %s2005_s20 }
  0x18   : > { %p51_p0 = scmp.ge.s32.totalorder %s49_s26, 2  ;;  %p93_p1 = scmp.ne.s32.totalorder %s2005_s20, %s2001_s19 }
  0x19   : > { %p94_p2 = scmp.eq.s32.totalorder %s2017_s23, 0  ;;  %p99_p3 = scmp.ne.s32.totalorder %s2001_s19, %s1997_s18 }
  0x1a   : > { %s2578_s26 = smov (%p51_p0, %s49_s26), 0  ;;  %p100_p5 = scmp.eq.s32.totalorder %s2137_s24, 0 }
  0x1b   : > { %2537 = sst [smem:[#allocation19_spill]] %s2578_s26  ;;  %p2149_p4 = por %p94_p2, %p93_p1 }
  0x1c   : > { %s81_s29 = ssub.s32 %s2013_s22, %s2578_s26  ;;  %p419_p6 = scmp.eq.s32.totalorder %s2137_s24, 1 }
  0x1d   : > { %p84_p7 = scmp.eq.s32.totalorder %s81_s29, 0  ;;  %p2157_p8 = por %p100_p5, %p99_p3 }
  0x1e   : > { %p2161_p9 = por %p419_p6, %p93_p1  ;;  %p425_p10 = scmp.eq.s32.totalorder %s1653_s25, 1 }
  0x1f   : > { %s2539_s30 = scalar_select %p2157_p8, 1, 0 }
  0x20   : > { %s2540_s16 = scalar_select %p2161_p9, 1, 0 }
  0x21   : > { %s2166_s17 = scalar_select %p84_p7, %s2005_s20, %s86_s27  }
  0x22   : > { %2541 = sst [smem:[#allocation20_spill]] %s2540_s16  ;;  %p2168_p11 = por %p425_p10, %p99_p3 }
  0x23   : > { %2542 = sst [smem:[#allocation21_spill]] %s2166_s17  ;;  %p1729_p13 = scmp.lt.s32.totalorder %s2017_s23, 2 }
  0x24   : > { %s2543_s18 = scalar_select %p2168_p11, 1, 0 }
  0x25   : > { %s2175_s29 = sand.u32 1, %s2005_s20   ;;  %s2181_s15 = sshll.u32 %s2013_s22, 8 }
  0x26   : > { %2544 = sst [smem:[#allocation22_spill]] %s2543_s18  ;;  %s2178_s26 = sshll.u32 %s2175_s29, 4 }
  0x27   : > { %p2185_p0 = pnand %p1729_p13, %p2149_p4  ;;  %s509_s27 = sand.u32 1, %s2017_s23  }
  0x28   : > { %s2546_s2 = sld [smem:[#allocation23_spill]]  ;;  %s513_s20 = scalar_lea.vmem [#allocation5], %s2178_s26 }
  0x29   : > { %s2545_s25 = scalar_select %p2185_p0, 1, 0 }
  0x2a   : > { %s523_s22 = sshll.u32 %s513_s20, 4  ;;  %s2201_s28 = scalar_lea.sflag [#allocation6], %s509_s27  ;;  %s2198_s22 = int_to_ptr.vmem [resolvable:$true] %s523_s22 }
  0x2b   : > { %p2207_p4 = pneg %p2185_p0 }
  0x2e   : > { %s2194_s16 = scalar_lea.hbm %s2546_s2, %s2181_s15  ;;  %s1812_s20 = scalar_lea.hbm %s2546_s2, 512 }
  0x2f   : > { %s1807_s13 = scalar_lea.hbm %s2194_s16, 256  ;;  %p1813_p7 = scmp.lt.u32.totalorder %s2194_s16, %s2546_s2 }
  0x30   : > { %p1808_p3 = scmp.ne.s32.totalorder %s2194_s16, %s1807_s13  ;;  %p1814_p10 = scmp.lt.u32.totalorder %s1812_s20, %s1807_s13 }
  0x31   : > { %p1816_p12 = scmp.lt.u32.totalorder %s1807_s13, %s2194_s16 }
  0x32   : > { %p1810_p5 = pnand %p2207_p4, %p1808_p3  ;;  %p1815_p13 = por %p1814_p10, %p1813_p7 }
  0x34   : > { %p1811_p6 = pneg %p1810_p5  ;;  %p1817_p1 = por %p1816_p12, %p1815_p13 }
  0x36   : > { %p1818_p2 = pnand %p1817_p1, %p1811_p6 }
  0x38   : > { %1821 = shalt.err (!%p1818_p2)
}
  0x39   : > { %s1822_s27 = scalar_lea.vmem %s2198_s22, 256  ;;  %s2019_s18 = smov [#allocation5]  }
  0x3a   : > { %p1823_p3 = scmp.ne.s32.totalorder %s2198_s22, %s1822_s27  ;;  %s1827_s17 = sshll.u32 %s2019_s18, 4  ;;  %s1828_s17 = int_to_ptr.vmem [resolvable:$false] %s1827_s17 }
  0x3b   : > { %s1829_s12 = scalar_lea.vmem %s1828_s17, 512  ;;  %p1830_p9 = scmp.lt.s32.totalorder %s2198_s22, %s1828_s17 }
  0x3c   : > { %p1825_p5 = pnand %p1823_p3, %p2207_p4  ;;  %p1831_p8 = scmp.lt.s32.totalorder %s1829_s12, %s1822_s27 }
  0x3e   : > { %p1826_p11 = pneg %p1825_p5  ;;  %p1832_p7 = por %p1831_p8, %p1830_p9 }
  0x40   : > { %p1833_p10 = pnand %p1832_p7, %p1826_p11 }
  0x42   : > { %1836 = shalt.err (!%p1833_p10)
}
  0x43   : > { %1718 = dma.hbm_to_vmem [thread:$0]  (!%p2185_p0), %s2194_s16, 256, %s2198_s22, %s2201_s28  }
  0x44   : > { %p2548_p12 = scmp.lt.s32.totalorder %s2017_s23, 3  ;;  %p2549_p1 = scmp.ge.s32.totalorder %s2017_s23, 1 }
  0x45   : > { %s2243_s27 = scalar_lea.hbm %s2495_s1, %s2181_s15  ;;  %s492_s18 = scalar_lea.vmem [#allocation2], %s2178_s26 }
  0x46   : > { %p2235_p2 = pnand %p2549_p1, %p2548_p12  ;;  %s502_s17 = sshll.u32 %s492_s18, 4  ;;  %s2246_s17 = int_to_ptr.vmem [resolvable:$true] %s502_s17 }
  0x47   : > { %s2252_s12 = scalar_lea.hbm %s2497_s3, %s2181_s15  ;;  %s489_s2 = scalar_lea.sflag [#allocation3], %s2175_s29 }
  0x48   : > { %s2550_s13 = scalar_select %p2235_p2, 1, 0 }
  0x49   : > { %s1837_s23 = scalar_lea.hbm %s2243_s27, 256  ;;  %s1842_s8 = scalar_lea.hbm %s2495_s1, 512 }
  0x4a   : > { %p1838_p8 = scmp.ne.s32.totalorder %s2243_s27, %s1837_s23  ;;  %p1843_p6 = scmp.lt.u32.totalorder %s2243_s27, %s2495_s1 }
  0x4b   : > { %p1844_p13 = scmp.lt.u32.totalorder %s1842_s8, %s1837_s23  ;;  %p1846_p5 = scmp.lt.u32.totalorder %s1837_s23, %s2243_s27 }
  0x4c   : > { %p1840_p9 = pnand %p1838_p8, %p2207_p4 }
  0x4d   : > { %p1845_p3 = por %p1844_p13, %p1843_p6 }
  0x4e   : > { %p1841_p11 = pneg %p1840_p9 }
  0x4f   : > { %p1847_p7 = por %p1846_p5, %p1845_p3 }
  0x51   : > { %p1848_p10 = pnand %p1847_p7, %p1841_p11 }
  0x53   : > { %1851 = shalt.err (!%p1848_p10)
}
  0x54   : > { %s1852_s18 = scalar_lea.vmem %s2246_s17, 256  ;;  %s2020_s22 = smov [#allocation2]  }
  0x55   : > { %p1853_p12 = scmp.ne.s32.totalorder %s2246_s17, %s1852_s18  ;;  %s1857_s16 = sshll.u32 %s2020_s22, 4  ;;  %s1858_s16 = int_to_ptr.vmem [resolvable:$false] %s1857_s16 }
  0x56   : > { %s1859_s6 = scalar_lea.vmem %s1858_s16, 512  ;;  %p1860_p9 = scmp.lt.s32.totalorder %s2246_s17, %s1858_s16 }
  0x57   : > { %p1855_p1 = pnand %p1853_p12, %p2207_p4  ;;  %p1861_p2 = scmp.lt.s32.totalorder %s1859_s6, %s1852_s18 }
  0x59   : > { %p1856_p8 = pneg %p1855_p1  ;;  %p1862_p6 = por %p1861_p2, %p1860_p9 }
  0x5b   : > { %p1863_p13 = pnand %p1862_p6, %p1856_p8 }
  0x5d   : > { %1866 = shalt.err (!%p1863_p13)
}
  0x5e   : > { %1715 = dma.hbm_to_vmem [thread:$0]  (!%p2185_p0), %s2243_s27, 256, %s2246_s17, %s489_s2  }
  0x5f   : > { %s534_s8 = scalar_lea.vmem [#allocation7], %s2178_s26  ;;  %s1867_s23 = scalar_lea.hbm %s2252_s12, 256 }
  0x60   : > { %s544_s10 = sshll.u32 %s534_s8, 4  ;;  %p1868_p11 = scmp.ne.s32.totalorder %s2252_s12, %s1867_s23  ;;  %s545_s10 = int_to_ptr.vmem [resolvable:$true] %s544_s10 }
  0x61   : > { %s1872_s18 = scalar_lea.hbm %s2497_s3, 512  ;;  %p1873_p5 = scmp.lt.u32.totalorder %s2252_s12, %s2497_s3 }
  0x62   : > { %p1870_p2 = pnand %p1868_p11, %p2207_p4  ;;  %p1874_p7 = scmp.lt.u32.totalorder %s1872_s18, %s1867_s23 }
  0x63   : > { %p1876_p12 = scmp.lt.u32.totalorder %s1867_s23, %s2252_s12 }
  0x64   : > { %p1871_p3 = pneg %p1870_p2  ;;  %p1875_p10 = por %p1874_p7, %p1873_p5 }
  0x66   : > { %p1877_p1 = por %p1876_p12, %p1875_p10 }
  0x68   : > { %p1878_p8 = pnand %p1877_p1, %p1871_p3 }
  0x6a   : > { %1881 = shalt.err (!%p1878_p8)
}
  0x6b   : > { %s1882_s2 = scalar_lea.vmem %s545_s10, 256  ;;  %s2021_s27 = smov [#allocation7]  }
  0x6c   : > { %p1883_p9 = scmp.ne.s32.totalorder %s545_s10, %s1882_s2  ;;  %s1887_s17 = sshll.u32 %s2021_s27, 4  ;;  %s1888_s17 = int_to_ptr.vmem [resolvable:$false] %s1887_s17 }
  0x6d   : > { %s1889_s6 = scalar_lea.vmem %s1888_s17, 512  ;;  %p1890_p11 = scmp.lt.s32.totalorder %s545_s10, %s1888_s17 }
  0x6e   : > { %p1885_p6 = pnand %p1883_p9, %p2207_p4  ;;  %p1891_p2 = scmp.lt.s32.totalorder %s1889_s6, %s1882_s2 }
  0x70   : > { %p1886_p13 = pneg %p1885_p6  ;;  %p1892_p0 = por %p1891_p2, %p1890_p11 }
  0x72   : > { %p1893_p5 = pnand %p1892_p0, %p1886_p13 }
  0x74   : > { %1896 = shalt.err (!%p1893_p5)
}
  0x75   : > { %p2551_p7 = scmp.ne.s32.totalorder %s2545_s25, 0  ;;  %s2299_s14 = scalar_lea.hbm %s2498_s4, %s2181_s15 }
  0x76   : > { %s555_s20 = scalar_lea.vmem [#allocation8], %s2178_s26  ;;  %s552_s22 = scalar_lea.sflag [#allocation9], %s2175_s29 }
  0x77   : > { %1721 = dma.hbm_to_vmem [thread:$0]  (!%p2551_p7), %s2252_s12, 256, %s545_s10, %s2201_s28  }
  0x78   : > { %s565_s18 = sshll.u32 %s555_s20, 4  ;;  %s1897_s16 = scalar_lea.hbm %s2299_s14, 256  ;;  %s566_s18 = int_to_ptr.vmem [resolvable:$true] %s565_s18 }
  0x79   : > { %p1898_p0 = scmp.ne.s32.totalorder %s2299_s14, %s1897_s16  ;;  %s1902_s12 = scalar_lea.hbm %s2498_s4, 512 }
  0x7a   : > { %p1903_p12 = scmp.lt.u32.totalorder %s2299_s14, %s2498_s4  ;;  %p1904_p1 = scmp.lt.u32.totalorder %s1902_s12, %s1897_s16 }
  0x7b   : > { %p1900_p3 = pnand %p1898_p0, %p2207_p4  ;;  %p1906_p9 = scmp.lt.u32.totalorder %s1897_s16, %s2299_s14 }
  0x7c   : > { %p1905_p8 = por %p1904_p1, %p1903_p12 }
  0x7d   : > { %p1901_p10 = pneg %p1900_p3 }
  0x7e   : > { %p1907_p6 = por %p1906_p9, %p1905_p8 }
  0x80   : > { %p1908_p13 = pnand %p1907_p6, %p1901_p10 }
  0x82   : > { %1911 = shalt.err (!%p1908_p13)
}
  0x83   : > { %s1912_s26 = scalar_lea.vmem %s566_s18, 256  ;;  %s2022_s29 = smov [#allocation8]  }
  0x84   : > { %p1913_p11 = scmp.ne.s32.totalorder %s566_s18, %s1912_s26  ;;  %s1917_s27 = sshll.u32 %s2022_s29, 4  ;;  %s1918_s27 = int_to_ptr.vmem [resolvable:$false] %s1917_s27 }
  0x85   : > { %s1919_s17 = scalar_lea.vmem %s1918_s27, 512  ;;  %p1920_p0 = scmp.lt.s32.totalorder %s566_s18, %s1918_s27 }
  0x86   : > { %p1915_p2 = pnand %p1913_p11, %p2207_p4  ;;  %p1921_p3 = scmp.lt.s32.totalorder %s1919_s17, %s1912_s26 }
  0x88   : > { %p1916_p5 = pneg %p1915_p2  ;;  %p1922_p7 = por %p1921_p3, %p1920_p0 }
  0x8a   : > { %p1923_p1 = pnand %p1922_p7, %p1916_p5 }
  0x8c   : > { %1926 = shalt.err (!%p1923_p1)
}
  0x8d   : > { %p2552_p12 = scmp.ne.s32.totalorder %s2545_s25, 0  ;;  %p2553_p10 = scmp.ne.s32.totalorder %s2550_s13, 0 }
  0x8e   : > { %s2323_s11 = sand.u32 (!%p2553_p10), 1, %s2001_s19   ;;  %p2554_p4 = scmp.ne.s32.totalorder (!%p2553_p10), %s2539_s30, 0 }
  0x8f   : > { %1724 = dma.hbm_to_vmem [thread:$0]  (!%p2552_p12), %s2299_s14, 256, %s566_s18, %s552_s22  }
  0x90   : > { %574 = sbr.rel (%p2553_p10) target bundleno = 910 (0x38e), region = 80  ;;  %s2326_s6 = sshll.u32 (!%p2553_p10), %s2323_s11, 4 }
  0x91   : > { %s577_s8 = scalar_lea.sflag (!%p2553_p10), [#allocation3], %s2323_s11  ;;  %s580_s23 = scalar_lea.vmem (!%p2553_p10), [#allocation2], %s2326_s6 }
  0x97   : > { %1980 = dma.done.wait (%p2554_p4), %s577_s8, 256  }
  0x98   : > { %1982 = vsyncadd (%p2554_p4), %s577_s8, 4294967040  ;;  %s585_s25 = sand.u32 1, %s2137_s24   ;;  %s589_s14 = scalar_lea.vmem [#allocation5], %s2326_s6 }
  0x99   : > { %s586_s13 = scalar_lea.sflag [#allocation6], %s585_s25 }
  0x9a   : > { %1984 = dma.done.wait (%p2554_p4), %s586_s13, 512  }
  0x9b   : > { %1986 = vsyncadd (%p2554_p4), %s586_s13, 4294966784  ;;  %s598_s20 = scalar_lea.vmem [#allocation7], %s2326_s6  ;;  %s604_s18 = scalar_lea.sflag [#allocation9], %s2323_s11 }
  0x9c   : > { %s607_s22 = scalar_lea.vmem [#allocation8], %s2326_s6 }
  0x9d   : > { %1988 = dma.done.wait (%p2554_p4), %s604_s18, 256  }
  0x9e   : > { %1990 = vsyncadd (%p2554_p4), %s604_s18, 4294967040  ;;  %p679_p7 = scmp.lt.s32.totalorder %s2009_s21, 1  ;;  %v2023_v0 = vmov 0.0   ;;  %v2024_v1 = vmov 0   ;;  %v2354_v3 = vld [vmem:[%s580_s23 + $0x8] sm:$0xff]  ;;  %vm710_vm0 = vcmask 64512  }
  0x9f   : > { %778 = vmatprep.mubr.f32.mxu0 %v2023_v0  ;;  %861 = vmatprep.mubr.f32.mxu1 %v2023_v0  ;;  %v2360_v5 = vld [vmem:[%s580_s23] sm:$0xff]  ;;  %v2372_v8 = vld [vmem:[%s589_s14 + $0x8] sm:$0xff]  ;;  %s2555_s23 = sld [smem:[#allocation24_spill]]  ;;  %s2558_s2 = sld [smem:[#allocation28_spill]]  ;;  %vm1106_vm1 = vcmask 326656  }
  0xa0   : > { %s680_s24 = scalar_select %p679_p7, %s2009_s21, 1  ;;  %1781 = vset.pattern.permute.xlu0 %v2024_v1  ;;  %1782 = vset.pattern.permute.xlu1 %v2024_v1  ;;  %v703_v6 = vld [vmem:[%s2499_s5] sm:$0xff]  ;;  %v2376_v9 = vld [vmem:[%s598_s20 + $0x8] sm:$0xff] }
  0xa1   : > { %797 = vmatprep.subr.mxu1 %v2354_v3  ;;  %v787_v7 = vld [vmem:[%s2501_s7] sm:$0xff]  ;;  %v2396_v13 = vld [vmem:[%s607_s22 + $0x8] sm:$0xff]  ;;  %s2559_s30 = sld [smem:[#allocation30_spill]]  ;;  %s2560_s26 = sld [smem:[#allocation27_spill]] }
  0xa2   : > { %s1692_s16 = sshll.u32 %s680_s24, 4  ;;  %798 = vmatpush1.msra.mxu1 %v2360_v5  ;;  %v2380_v10 = vld [vmem:[%s589_s14] sm:$0xff]  ;;  %s2556_s14 = sld [smem:[#allocation26_spill]] }
  0xa3   : > { %s686_s12 = scalar_lea.vmem %s2494_s0, %s1692_s16  ;;  %1677 = vmatmul.mubr.msk.f32.vlgmr.msra.gmra.mrb[0].mxu1 %vm710_vm0, %v787_v7  ;;  %v2386_v11 = vld [vmem:[%s598_s20] sm:$0xff]  ;;  %953 = vmatprep.subr.mxu1 %v2376_v9  ;;  %s2561_s17 = sld [smem:[#allocation29_spill]] }
  0xa4   : > { %v2352_v2 = vld [vmem:[%s686_s12 + $0x8] sm:$0xff]  ;;  %v2356_v4 = vld [vmem:[%s686_s12] sm:$0xff]  ;;  %954 = vmatpush1.msra.mxu1 %v2386_v11  ;;  %1017 = vmatprep.mubr.f32.mxu1 %v2023_v0  ;;  %s2562_s8 = sld [smem:[#allocation20_spill]]  ;;  %s677_s25 = scalar_lea.vmem [#allocation10], %s2326_s6 }
  0xa5   : > { %714 = vmatprep.subr.mxu0 %v2352_v2  ;;  %v870_v12 = vld [vmem:[%s2503_s9] sm:$0xff]  ;;  %s1475_s13 = sshll.u32 %s677_s25, 4  ;;  %s2563_s18 = sld [smem:[#allocation31_spill]]  ;;  %s2447_s13 = int_to_ptr.vmem [resolvable:$true] %s1475_s13 }
  0xa6   : > { %715 = vmatpush1.msra.mxu0 %v2356_v4  ;;  %v2401_v14 = vld [vmem:[%s607_s22] sm:$0xff]  ;;  %s2557_s22 = sld [smem:[#allocation25_spill]]  ;;  %s1459_s16 = scalar_lea.sflag [#allocation4], %s2323_s11 }
  0xa7   : > { %1676 = vmatmul.mubr.msk.f32.vlgmr.msra.gmra.mrb[0].mxu0 %vm710_vm0, %v703_v6  ;;  %880 = vmatprep.subr.mxu0 %v2372_v8  ;;  %v704_v15 = vld [vmem:[%s2555_s23] sm:$0xff]  ;;  %s1693_s23 = sshll.u32 %s2009_s21, 8  ;;  %s2025_s21 = smov [#allocation10]  }
  0xa8   : > { %881 = vmatpush1.msra.mxu0 %v2380_v10  ;;  %944 = vmatprep.mubr.f32.mxu0 %v2023_v0  ;;  %v871_v16 = vld [vmem:[%s2556_s14] sm:$0xff]  ;;  %s1931_s6 = sshll.u32 %s2025_s21, 4  ;;  %s1932_s6 = int_to_ptr.vmem [resolvable:$false] %s1931_s6 }
  0xa9   : > { %1679 = vmatmul.mubr.msk.f32.vlgmr.msra.gmra.mrb[2].mxu1 %vm710_vm0, %v870_v12  ;;  %1026 = vmatprep.subr.mxu0 %v2396_v13  ;;  %v1100_v18 = vld [vmem:[%s2558_s2] sm:$0x1f]  ;;  %s1927_s2 = scalar_lea.vmem %s2447_s13, 256  ;;  %s1933_s28 = scalar_lea.vmem %s1932_s6, 512 }
  0xaa   : > { %707 = vperm.xlu0 %1781, %v704_v15   ;;  %874 = vperm.xlu1 %1782, %v871_v16   ;;  %v1374_v19 = vld [vmem:[%s2559_s30] sm:$0xff]  ;;  %p1928_p8 = scmp.ne.s32.totalorder %s2447_s13, %s1927_s2  ;;  %p2565_p9 = scmp.ne.s32.totalorder %s2562_s8, 0 }
  0xab   : > { %1678 = vmatmul.mubr.msk.f32.vlgmr.msra.gmra.mrb[2].mxu0 %vm710_vm0, %v870_v12  ;;  %1174 = vmatprep.mubr.f32.mxu1 %v2023_v0  ;;  %v1099_v57 = vld [vmem:[%s2560_s26] sm:$0x1f]  ;;  %s2564_s24 = smov %s2563_s18  ;;  %p1934_p11 = scmp.lt.s32.totalorder %s2447_s13, %s1932_s6 }
  0xac   : > { %1090 = vmatprep.mubr.f32.mxu0 %v2023_v0  ;;  %1027 = vmatpush1.msra.mxu0 %v2401_v14  ;;  %v788_v17 = vld [vmem:[%s2557_s22] sm:$0xff]  ;;  %s2445_s22 = scalar_lea.hbm %s2563_s18, %s1693_s23  ;;  %p1929_p6 = pnand %p1928_p8, %p2565_p9 }
  0xad   : > { %p1935_p2 = scmp.lt.s32.totalorder %s1933_s28, %s1927_s2 }
  0xae   : > { %791 = vperm.xlu0 %1781, %v788_v17   ;;  %1103 = vperm.xlu1 %1782, %v1100_v18   ;;  %p1930_p13 = pneg %p1929_p6 }
  0xaf   : > { %1680 = vmatmul.mubr.msk.f32.vlgmr.msra.gmra.mrb[4].mxu0 %vm710_vm0, %v870_v12  ;;  %p1936_p5 = por %p1935_p2, %p1934_p11 }
  0xb0   : > { %1447 = vmatprep.mubr.f32.mxu0 %v2023_v0 }
  0xb1   : > { %p1937_p0 = pnand %p1936_p5, %p1930_p13 }
  0xb2   : > { %1377 = vperm.xlu0 %1781, %v1374_v19  }
 0x129   : > { %v708_v20 = vpop.permute.xlu0 %707  ;;  %v875_v32 = vpop.permute.xlu1 %874 }
 0x12d   : > { %v792_v21 = vpop.permute.xlu0 %791  ;;  %v1104_v58 = vpop.permute.xlu1 %1103 }
 0x176   : > { %v863_v23 = vpop.f32.mrb[0].mxu1 }
 0x177   : > { %v864_v25 = vadd.f32 %v863_v23, %v792_v21  ;;  %v865_v27 = vpop.f32.mrb[1].mxu1 }
 0x178   : > { %v866_v29 = vadd.f32 %v865_v27, %v792_v21 }
 0x179   : > { %v868_v31 = vmax.f32 %v864_v25, 0.0 }
 0x17a   : > { %v780_v22 = vpop.f32.mrb[0].mxu0  ;;  %v869_v34 = vmax.f32 %v866_v29, 0.0 }
 0x17b   : > { %v781_v24 = vadd.f32 %v780_v22, %v708_v20  ;;  %v782_v26 = vpop.f32.mrb[1].mxu0 }
 0x17c   : > { %v783_v28 = vadd.f32 %v782_v26, %v708_v20  ;;  %v1019_v36 = vpop.f32.mrb[2].mxu1 }
 0x17d   : > { %v785_v30 = vmax.f32 %v781_v24, 0.0  ;;  %v1020_v39 = vadd.f32 %v1019_v36, %v875_v32  ;;  %v1021_v41 = vpop.f32.mrb[3].mxu1 }
 0x17e   : > { %v786_v33 = vmax.f32 %v783_v28, 0.0  ;;  %v946_v35 = vpop.f32.mrb[2].mxu0  ;;  %v1022_v44 = vadd.f32 %v1021_v41, %v875_v32 }
 0x17f   : > { %v1696_v37 = vpack.c.bf16 %v868_v31, %v785_v30  ;;  %v947_v38 = vadd.f32 %v946_v35, %v875_v32  ;;  %v948_v40 = vpop.f32.mrb[3].mxu0  ;;  %v1024_v46 = vmax.f32 %v1020_v39, 0.0 }
 0x180   : > { %v1694_v42 = vpack.c.bf16 %v869_v34, %v786_v33  ;;  %v949_v43 = vadd.f32 %v948_v40, %v875_v32  ;;  %v1025_v48 = vmax.f32 %v1022_v44, 0.0 }
 0x181   : > { %v951_v45 = vmax.f32 %v947_v38, 0.0 }
 0x182   : > { %v952_v47 = vmax.f32 %v949_v43, 0.0  ;;  %v1092_v49 = vpop.f32.mrb[4].mxu0  ;;  %1695 = vmatprep.subr.bf16.mxu1 %v1694_v42 }
 0x183   : > { %v1700_v50 = vpack.c.bf16 %v1024_v46, %v951_v45  ;;  %v1094_v51 = vpop.f32.mrb[5].mxu0  ;;  %1697 = vmatpush1.bf16.msra.mxu1 %v1696_v37  ;;  %v1093_v54 = vadd.f32 %v1092_v49, %v875_v32 }
 0x184   : > { %v1698_v52 = vpack.c.bf16 %v1025_v48, %v952_v47  ;;  %v1095_v53 = vadd.f32 %v1094_v51, %v875_v32 }
 0x185   : > { %v1097_v56 = vmax.f32 %v1093_v54, 0.0 }
 0x186   : > { %v1098_v55 = vmax.f32 %v1095_v53, 0.0  ;;  %1699 = vmatprep.subr.bf16.mxu1 %v1698_v52 }
 0x187   : > { %1701 = vmatpush1.bf16.msra.mxu1 %v1700_v50 }
 0x188   : > { %1118 = vmatprep.subr.mxu1 %v1098_v55 }
 0x18b   : > { %1119 = vmatpush1.msra.mxu1 %v1097_v56 }
 0x18c   : > { %1681 = vmatmul.mubr.msk.f32.vlgmr.msra.gmra.mrb[4].mxu1 %vm1106_vm1, %v1099_v57 }
 0x25f   : > { %v1176_v59 = vpop.f32.mrb[4].mxu1 }
 0x260   : > { %v1177_v60 = vadd.f32 %v1176_v59, %v1104_v58  ;;  %v1178_v61 = vpop.f32.mrb[5].mxu1 }
 0x261   : > { %v1179_v62 = vadd.f32 %v1178_v61, %v1104_v58 }
 0x262   : > { %v1183_v63 = vrot.slane %v1177_v60, 1  ;;  %v1197_v16 = vrot.slane %v1177_v60, 4 }
 0x263   : > { %v1184_v0 = vrot.slane %v1179_v62, 1  ;;  %v1198_v18 = vrot.slane %v1179_v62, 4 }
 0x264   : > { %v1187_v1 = vmax.f32 %v1177_v60, %v1183_v63 }
 0x265   : > { %v1188_v6 = vmax.f32 %v1179_v62, %v1184_v0 }
 0x266   : > { %v1191_v7 = vrot.slane %v1187_v1, 2 }
 0x267   : > { %v1192_v12 = vrot.slane %v1188_v6, 2 }
 0x268   : > { %v1195_v15 = vmax.f32 %v1187_v1, %v1191_v7 }
 0x269   : > { %v1196_v17 = vmax.f32 %v1188_v6, %v1192_v12 }
 0x26a   : > { %v1201_v19 = vmax.f32 %v1195_v15, %v1197_v16 }
 0x26b   : > { %v1202_v20 = vmax.f32 %v1196_v17, %v1198_v18 }
 0x26c   : > { %v1203_v21 = vsub.f32 %v1177_v60, %v1201_v19  ;;  %v1211_v22 = vrot.slane %v1201_v19, 7  ;;  %v1221_v23 = vrot.slane %v1201_v19, 6  ;;  %v1231_v24 = vrot.slane %v1201_v19, 5 }
 0x26d   : > { %v1204_v25 = vsub.f32 %v1179_v62, %v1202_v20  ;;  %v1212_v26 = vrot.slane %v1202_v20, 7  ;;  %v1222_v27 = vrot.slane %v1202_v20, 6  ;;  %v1232_v28 = vrot.slane %v1202_v20, 5 }
 0x26e   : > { %v1242_v29 = vrot.slane %v1202_v20, 4  ;;  %v1205_v30 = vmul.f32 1.442695, %v1203_v21  ;;  %v1215_v31 = vsub.f32 %v1177_v60, %v1211_v22  ;;  %v1225_v32 = vsub.f32 %v1177_v60, %v1221_v23 }
 0x26f   : > { %v1207_v33 = vmul.f32 1.442695, %v1204_v25  ;;  %v1216_v34 = vsub.f32 %v1179_v62, %v1212_v26  ;;  %v1226_v35 = vsub.f32 %v1179_v62, %v1222_v27  ;;  %v1236_v36 = vsub.f32 %v1179_v62, %v1232_v28 }
 0x270   : > { %v1246_v37 = vsub.f32 %v1179_v62, %v1242_v29  ;;  %1783 = vpow2.f32 %v1205_v30  ;;  %v1217_v38 = vmul.f32 1.442695, %v1215_v31  ;;  %v1235_v43 = vsub.f32 %v1177_v60, %v1231_v24 }
 0x271   : > { %1785 = vpow2.f32 %v1207_v33  ;;  %v1219_v39 = vmul.f32 1.442695, %v1216_v34  ;;  %v1229_v40 = vmul.f32 1.442695, %v1226_v35  ;;  %v1239_v41 = vmul.f32 1.442695, %v1236_v36 }
 0x272   : > { %v1249_v42 = vmul.f32 1.442695, %v1246_v37  ;;  %1787 = vpow2.f32 %v1217_v38  ;;  %v1241_v44 = vrot.slane %v1201_v19, 4  ;;  %v1227_v45 = vmul.f32 1.442695, %v1225_v32 }
 0x273   : > { %1789 = vpow2.f32 %v1219_v39  ;;  %v1237_v46 = vmul.f32 1.442695, %v1235_v43  ;;  %v1289_v21 = vlaneseq }
 0x274   : > { %1791 = vpow2.f32 %v1229_v40  ;;  %v1245_v47 = vsub.f32 %v1177_v60, %v1241_v44 }
 0x275   : > { %1793 = vpow2.f32 %v1239_v41  ;;  %v1290_v22 = vshrl.u32 %v1289_v21, 7 }
 0x276   : > { %1795 = vpow2.f32 %v1249_v42  ;;  %v1247_v48 = vmul.f32 1.442695, %v1245_v47 }
 0x277   : > { %1797 = vpow2.f32 %v1227_v45  ;;  %v1291_v23 = vsub.s32 0, %v1290_v22  ;;  %v1309_v25 = vsub.s32 1, %v1290_v22  ;;  %v1327_v26 = vsub.s32 2, %v1290_v22 }
 0x278   : > { %1799 = vpow2.f32 %v1237_v46  ;;  %v1345_v32 = vsub.s32 3, %v1290_v22  ;;  %v1363_v34 = vsub.s32 4, %v1290_v22 }
 0x279   : > { %1801 = vpow2.f32 %v1247_v48 }
 0x27a   : > { %v1784_v49 = vpop.eup %1783 }
 0x27b   : > { %v1786_v50 = vpop.eup %1785 }
 0x27c   : > { %v1788_v51 = vpop.eup %1787 }
 0x27d   : > { %v1790_v52 = vpop.eup %1789  ;;  %v1253_v53 = vrot.slane %v1788_v51, 1 }
 0x27e   : > { %v1792_v54 = vpop.eup %1791  ;;  %v1254_v55 = vrot.slane %v1790_v52, 1 }
 0x27f   : > { %v1794_v56 = vpop.eup %1793  ;;  %v1262_v59 = vrot.slane %v1792_v54, 2  ;;  %v1257_v61 = vadd.f32 %v1784_v49, %v1253_v53 }
 0x280   : > { %v1796_v57 = vpop.eup %1795  ;;  %v1258_v58 = vadd.f32 %v1786_v50, %v1254_v55  ;;  %v1270_v0 = vrot.slane %v1794_v56, 3 }
 0x281   : > { %v1798_v62 = vpop.eup %1797  ;;  %v1278_v12 = vrot.slane %v1796_v57, 4 }
 0x282   : > { %v1800_v60 = vpop.eup %1799  ;;  %v1266_v63 = vadd.f32 %v1262_v59, %v1258_v58  ;;  %v1261_v1 = vrot.slane %v1798_v62, 2 }
 0x283   : > { %v1802_v6 = vpop.eup %1801  ;;  %v1269_v16 = vrot.slane %v1800_v60, 3 }
 0x284   : > { %v1274_v7 = vadd.f32 %v1270_v0, %v1266_v63  ;;  %v1265_v15 = vadd.f32 %v1261_v1, %v1257_v61  ;;  %v1277_v19 = vrot.slane %v1802_v6, 4 }
 0x286   : > { %v1282_v17 = vadd.f32 %v1278_v12, %v1274_v7  ;;  %v1273_v18 = vadd.f32 %v1269_v16, %v1265_v15 }
 0x288   : > { %1803 = vrcp.f32 %v1282_v17  ;;  %v1281_v20 = vadd.f32 %v1277_v19, %v1273_v18 }
 0x28a   : > { %1805 = vrcp.f32 %v1281_v20 }
 0x292   : > { %v1804_v24 = vpop.eup %1803 }
 0x293   : > { %v1288_v27 = vmul.f32 %v1804_v24, %v1786_v50  ;;  %v1302_v28 = vrot.slane %v1804_v24, 7  ;;  %v1320_v29 = vrot.slane %v1804_v24, 6  ;;  %v1338_v30 = vrot.slane %v1804_v24, 5 }
 0x294   : > { %v1806_v31 = vpop.eup %1805  ;;  %v1356_v33 = vrot.slane %v1804_v24, 4 }
 0x295   : > { %v1296_v35 = vrot.slane %v1288_v27, %v1291_v23  ;;  %v1306_v36 = vmul.f32 %v1790_v52, %v1302_v28  ;;  %v1324_v37 = vmul.f32 %v1792_v54, %v1320_v29  ;;  %v1342_v38 = vmul.f32 %v1794_v56, %v1338_v30 }
 0x296   : > { %v1360_v39 = vmul.f32 %v1796_v57, %v1356_v33  ;;  %v1287_v40 = vmul.f32 %v1806_v31, %v1784_v49  ;;  %v1301_v41 = vrot.slane %v1806_v31, 7  ;;  %v1319_v42 = vrot.slane %v1806_v31, 6 }
 0x297   : > { %v1314_v43 = vrot.slane %v1306_v36, %v1309_v25  ;;  %v1332_v44 = vrot.slane %v1324_v37, %v1327_v26  ;;  %v1298_v48 = vmul.f32 %v1296_v35, %v2352_v2  ;;  %v1350_v53 = vrot.slane %v1342_v38, %v1345_v32 }
 0x298   : > { %v1292_v45 = vrot.slane %v1287_v40, %v1291_v23  ;;  %v1305_v46 = vmul.f32 %v1788_v51, %v1301_v41  ;;  %v1323_v47 = vmul.f32 %v1798_v62, %v1319_v42  ;;  %v1337_v55 = vrot.slane %v1806_v31, 5 }
 0x299   : > { %v1316_v50 = vmul.f32 %v1314_v43, %v2354_v3  ;;  %v1368_v58 = vrot.slane %v1360_v39, %v1363_v34  ;;  %v1334_v56 = vmul.f32 %v1332_v44, %v2372_v8  ;;  %v1355_v57 = vrot.slane %v1806_v31, 4 }
 0x29a   : > { %v1310_v59 = vrot.slane %v1305_v46, %v1309_v25  ;;  %v1328_v52 = vrot.slane %v1323_v47, %v1327_v26  ;;  %v1341_v49 = vmul.f32 %v1800_v60, %v1337_v55  ;;  %v1297_v61 = vmul.f32 %v1292_v45, %v2356_v4 }
 0x29b   : > { %v1318_v54 = vadd.f32 %v1316_v50, %v1298_v48  ;;  %v1352_v62 = vmul.f32 %v1350_v53, %v2376_v9  ;;  %v1359_v0 = vmul.f32 %v1802_v6, %v1355_v57  ;;  %v1370_v12 = vmul.f32 %v1368_v58, %v2396_v13  ;;  %v1373_v6 = vld [vmem:[%s2561_s17] sm:$0xff] }
 0x29c   : > { %v1315_v63 = vmul.f32 %v1310_v59, %v2360_v5  ;;  %v1346_v2 = vrot.slane %v1341_v49, %v1345_v32  ;;  %v1333_v1 = vmul.f32 %v1328_v52, %v2380_v10  ;;  %v1378_v10 = vpop.permute.xlu0 %1377 }
 0x29d   : > { %v1336_v51 = vadd.f32 %v1334_v56, %v1318_v54  ;;  %v1364_v15 = vrot.slane %v1359_v0, %v1363_v34 }
 0x29e   : > { %v1317_v3 = vadd.f32 %v1315_v63, %v1297_v61  ;;  %v1351_v60 = vmul.f32 %v1346_v2, %v2386_v11 }
 0x29f   : > { %v1354_v7 = vadd.f32 %v1352_v62, %v1336_v51  ;;  %v1369_v5 = vmul.f32 %v1364_v15, %v2401_v14 }
 0x2a0   : > { %v1335_v8 = vadd.f32 %v1333_v1, %v1317_v3 }
 0x2a1   : > { %v1372_v4 = vadd.f32 %v1370_v12, %v1354_v7 }
 0x2a2   : > { %v1353_v16 = vadd.f32 %v1351_v60, %v1335_v8 }
 0x2a3   : > { %1383 = vmatprep.subr.mxu0 %v1372_v4 }
 0x2a4   : > { %v1371_v9 = vadd.f32 %v1369_v5, %v1353_v16 }
 0x2a6   : > { %1384 = vmatpush1.msra.mxu0 %v1371_v9 }
 0x2a7   : > { %1682 = vmatmul.mubr.msk.f32.vlgmr.msra.gmra.mrb[6].mxu0 %vm710_vm0, %v1373_v6 }
 0x37a   : > { %v1449_v13 = vpop.f32.mrb[6].mxu0 }
 0x37b   : > { %v1450_v17 = vadd.f32 %v1449_v13, %v1378_v10  ;;  %v1451_v18 = vpop.f32.mrb[7].mxu0 }
 0x37c   : > { %v1452_v11 = vadd.f32 %v1451_v18, %v1378_v10 }
 0x37d   : > { %v1454_v14 = vmax.f32 %v1450_v17, 0.0 }
 0x37e   : > { %v1455_v19 = vmax.f32 %v1452_v11, 0.0 }
 0x37f   : > { %1456 = vst [vmem:[%s677_s25] sm:$0xff] %v1454_v14 }
 0x380   : > { %1457 = vst [vmem:[%s677_s25 + $0x8] sm:$0xff] %v1455_v19 }
 0x381   : > { %1940 = shalt.err (!%p1937_p0)
}
 0x382   : > { %s1941_s11 = scalar_lea.hbm %s2445_s22, 256  ;;  %s1945_s10 = scalar_lea.hbm %s2564_s24, 512 }
 0x383   : > { %p1942_p3 = scmp.ne.s32.totalorder %s2445_s22, %s1941_s11  ;;  %p1946_p10 = scmp.lt.u32.totalorder %s2445_s22, %s2564_s24 }
 0x384   : > { %p1947_p4 = scmp.lt.u32.totalorder %s1945_s10, %s1941_s11  ;;  %p1949_p8 = scmp.lt.u32.totalorder %s1941_s11, %s2445_s22 }
 0x385   : > { %p1943_p1 = pnand %p1942_p3, %p2565_p9 }
 0x386   : > { %p1948_p7 = por %p1947_p4, %p1946_p10 }
 0x387   : > { %p1944_p12 = pneg %p1943_p1 }
 0x388   : > { %p1950_p6 = por %p1949_p8, %p1948_p7 }
 0x38a   : > { %p1951_p13 = pnand %p1950_p6, %p1944_p12 }
 0x38c   : > { %1954 = shalt.err (!%p1951_p13)
}
 0x38d   : > { %1710 = dma.vmem_to_hbm [thread:$0]  (%p2565_p9), %s2447_s13, 256, %s2445_s22, %s1459_s16  }
 0x38e PF: > { %s2566_s29 = sld [smem:[#allocation15_spill]]  ;;  %s2567_s27 = sld [smem:[#allocation22_spill]] }
 0x38f   : > { %s2568_s17 = sld [smem:[#allocation18_spill]] }
 0x394   : > { %s1487_s23 = sand.u32 1, %s2566_s29   ;;  %p2569_p11 = scmp.ne.s32.totalorder %s2567_s27, 0 }
 0x395   : > { %p2570_p2 = scmp.ge.s32.totalorder %s2568_s17, 2  ;;  %s1488_s25 = scalar_lea.sflag [#allocation4], %s1487_s23 }
 0x397   : > { %p1726_p5 = pnand %p2570_p2, %p2569_p11 }
 0x399   : > { %1992 = dma.done.wait (!%p1726_p5), %s1488_s25, 256  }
 0x39a   : > { %1994 = vsyncadd (!%p1726_p5), %s1488_s25, 4294967040  ;;  %s37_s23 = sadd.s32 1, %s2568_s17   ;;  %s2571_s14 = sld [smem:[#allocation16_spill]] }
 0x39b   : > { %p34_p0 = scmp.ge.s32.totalorder %s37_s23, 4   ;;  %s2572_s20 = sld [smem:[#allocation21_spill]] }
 0x39c   : > { %s2573_s21 = sld [smem:[#allocation17_spill]]  ;;  %s2574_s22 = sld [smem:[#allocation19_spill]] }
 0x39d   : > { %s2575_s18 = smov %s2001_s19  ;;  %36 = sbr.rel (!%p34_p0) target bundleno = 20 (0x14), region = 165 }
 0x3a0   : > { %s2576_s19 = smov %s2571_s14 }
 0x3a4   :  { %1493 = vsyncpa [#allocation3], 1 }
 0x3a5   :  { %1495 = vsyncpa [#allocation3 + $0x1], 1 }
 0x3a6   :  { %1496 = vsyncpa [#allocation6], 1 }
 0x3a7   :  { %1498 = vsyncpa [#allocation6 + $0x1], 1 }
 0x3a8   :  { %1499 = vsyncpa [#allocation9], 1 }
 0x3a9   :  { %1501 = vsyncpa [#allocation9 + $0x1], 1 }
 0x3aa   :  { %1502 = vsyncpa [#allocation4], 1 }
 0x3ab   :  { %1504 = vsyncpa [#allocation4 + $0x1], 1 }

</bundles_post_ra>
